<compile_context>
chip_gen: v7x
topology: tpu7x:2x2x1
jax: 0.10.0
libtpu: 0.0.40
codegen_flags: <defaults>
</compile_context>

<pallas_src>
import jax
import jax.numpy as jnp
from jax import lax
from jax.experimental import pallas as pl
from jax.experimental.pallas import tpu as pltpu

BN_EPS = 1e-5


def _vmem_limit_bytes():
    # Generation-aware scoped-VMEM budget with headroom (v7x: 64 MiB phys -> ~48 MiB;
    # v5e/v6e: 128 MiB phys -> ~96 MiB).
    try:
        cap = int(pltpu.get_tpu_info().vmem_capacity_bytes)
    except Exception:
        cap = 64 * 1024 * 1024
    return min((cap * 3) // 4, 110 * 1024 * 1024)


# ---------------------------------------------------------------------------
# Fused multi-layer GIN kernel (grid = (num_layer,), h resident in VMEM via out_ref)
# ---------------------------------------------------------------------------
def _make_fused_gnn_kernel(n_nodes):
    inv_n = 1.0 / float(n_nodes)

    def kernel(a_hbm, h0_ref, eagg_ref, w1_ref, b1_ref, w2_ref, b2_ref,
               gamma_ref, beta_ref, out_ref, a_vmem, dma_sem):
        l = pl.program_id(0)
        is_last = l == pl.num_programs(0) - 1

        # Layer 0: pull the layer-invariant adjacency into VMEM once, and seed the
        # h carrier (out_ref, constant block index => stays in VMEM across layers).
        @pl.when(l == 0)
        def _():
            cp = pltpu.make_async_copy(a_hbm, a_vmem, dma_sem)
            cp.start()
            out_ref[...] = h0_ref[...]          # AtomEncoder output
            cp.wait()

        h = out_ref[...]                         # (N, D) f32, VMEM-resident across layers

        # ---- GIN message passing (aggr='add', message = x_src + bond_emb) ----
        #   agg[dst] = sum_{e: dst_e = dst} (h[src_e] + eemb_e) = (A @ h)[dst] + eagg[dst]
        agg = jnp.dot(a_vmem[...], h, preferred_element_type=jnp.float32) + eagg_ref[0]

        # ---- GIN update MLP: Linear(D, 2D) -> ReLU -> Linear(2D, D) ----
        h1 = jnp.dot(agg, w1_ref[0], preferred_element_type=jnp.float32) + b1_ref[0]
        h1 = jnp.maximum(h1, 0.0)
        h2 = jnp.dot(h1, w2_ref[0], preferred_element_type=jnp.float32) + b2_ref[0]

        # ---- BatchNorm1d (training-mode batch stats), two-pass variance ----
        mean = jnp.sum(h2, axis=0, keepdims=True) * inv_n
        c = h2 - mean
        var = jnp.sum(c * c, axis=0, keepdims=True) * inv_n
        hbn = c * (gamma_ref[0] * lax.rsqrt(var + BN_EPS)) + beta_ref[0]

        # ReLU on all but the last layer; dropout(drop_ratio=0) is the identity.
        @pl.when(is_last)
        def _():
            out_ref[...] = hbn

        @pl.when(jnp.logical_not(is_last))
        def _():
            out_ref[...] = jnp.maximum(hbn, 0.0)

    return kernel


def fused_gnn_forward(adj, h0, eagg, w1, b1, w2, b2, gamma, beta):
    num_layer, n_nodes, emb_dim = eagg.shape

    grid_spec = pltpu.PrefetchScalarGridSpec(
        num_scalar_prefetch=0,
        grid=(num_layer,),
        in_specs=[
            pl.BlockSpec(memory_space=pl.ANY),                              # adjacency (HBM, copied once)
            pl.BlockSpec((n_nodes, emb_dim), lambda l: (0, 0)),             # h0 (constant block)
            pl.BlockSpec((1, n_nodes, emb_dim), lambda l: (l, 0, 0)),       # per-layer aggregated bond emb
            pl.BlockSpec((1, emb_dim, 2 * emb_dim), lambda l: (l, 0, 0)),   # w1
            pl.BlockSpec((1, 1, 2 * emb_dim), lambda l: (l, 0, 0)),         # b1
            pl.BlockSpec((1, 2 * emb_dim, emb_dim), lambda l: (l, 0, 0)),   # w2
            pl.BlockSpec((1, 1, emb_dim), lambda l: (l, 0, 0)),             # b2
            pl.BlockSpec((1, 1, emb_dim), lambda l: (l, 0, 0)),             # gamma
            pl.BlockSpec((1, 1, emb_dim), lambda l: (l, 0, 0)),             # beta
        ],
        out_specs=pl.BlockSpec((n_nodes, emb_dim), lambda l: (0, 0)),       # running h / final output
        scratch_shapes=[
            pltpu.VMEM((n_nodes, n_nodes), jnp.float32),                    # adjacency, loaded once
            pltpu.SemaphoreType.DMA,                                        # for the one-time A copy
        ],
    )

    flops = int(num_layer * (2 * n_nodes * n_nodes * emb_dim
                             + 8 * n_nodes * emb_dim * emb_dim))
    bytes_accessed = int(4 * (adj.size + h0.size + eagg.size + w1.size + b1.size
                              + w2.size + b2.size + gamma.size + beta.size
                              + n_nodes * emb_dim))

    return pl.pallas_call(
        _make_fused_gnn_kernel(n_nodes),
        out_shape=jax.ShapeDtypeStruct((n_nodes, emb_dim), jnp.float32),
        grid_spec=grid_spec,
        compiler_params=pltpu.CompilerParams(
            dimension_semantics=("arbitrary",),      # layer loop carries state in out_ref / scratch
            vmem_limit_bytes=_vmem_limit_bytes(),
        ),
        cost_estimate=pl.CostEstimate(flops=flops,
                                      transcendentals=int(num_layer * emb_dim),
                                      bytes_accessed=bytes_accessed),
    )(adj, h0, eagg, w1, b1, w2, b2, gamma, beta)


# ---------------------------------------------------------------------------
# Parameter init (deterministic, synthetic — no checkpoint loading)
# ---------------------------------------------------------------------------
def init_params(key, num_layer, emb_dim, atom_vocab_sizes, bond_vocab_sizes):
    params = {}
    keys = iter(jax.random.split(key, 64))

    # AtomEncoder: sum of per-feature embedding tables.
    params["atom_emb"] = [
        0.1 * jax.random.normal(next(keys), (v, emb_dim), jnp.float32)
        for v in atom_vocab_sizes
    ]

    layers = []
    for _ in range(num_layer):
        lp = {}
        lp["bond_emb"] = [
            0.1 * jax.random.normal(next(keys), (v, emb_dim), jnp.float32)
            for v in bond_vocab_sizes
        ]
        lp["w1"] = 0.1 * jax.random.normal(next(keys), (emb_dim, 2 * emb_dim), jnp.float32)
        lp["b1"] = 0.01 * jax.random.normal(next(keys), (1, 2 * emb_dim), jnp.float32)
        lp["w2"] = 0.1 * jax.random.normal(next(keys), (2 * emb_dim, emb_dim), jnp.float32)
        lp["b2"] = 0.01 * jax.random.normal(next(keys), (1, emb_dim), jnp.float32)
        lp["gamma"] = jnp.ones((1, emb_dim), jnp.float32)
        lp["beta"] = jnp.zeros((1, emb_dim), jnp.float32)
        layers.append(lp)
    params["layers"] = layers
    return params


# ---------------------------------------------------------------------------
# Full forward (GNN.forward, gnn_type='gin', JK='last', drop_ratio=0)
# ---------------------------------------------------------------------------
@jax.jit
def gnn_forward(params, x, edge_index, edge_attr):
    emb_dim = params["atom_emb"][0].shape[1]
    N = x.shape[0]
    src = edge_index[0]
    dst = edge_index[1]

    # AtomEncoder (integer embedding gathers: XLA glue, not kernel work).
    h0 = params["atom_emb"][0][x[:, 0]]
    for i in range(1, len(params["atom_emb"])):
        h0 = h0 + params["atom_emb"][i][x[:, i]]                               # (N, D)

    # Layer-invariant dense adjacency A[dst, src] (edge multiplicity preserved).
    adj = jnp.zeros((N, N), jnp.float32).at[dst, src].add(1.0)                 # (N, N)

    # BondEncoder per layer, pre-aggregated over destination nodes: (L, N, D).
    eaggs = []
    for lp in params["layers"]:
        e = lp["bond_emb"][0][edge_attr[:, 0]]
        for i in range(1, len(lp["bond_emb"])):
            e = e + lp["bond_emb"][i][edge_attr[:, i]]
        eaggs.append(jnp.zeros((N, emb_dim), jnp.float32).at[dst].add(e))
    eagg = jnp.stack(eaggs, axis=0)                                            # (L, N, D)

    # Stack per-layer parameters (true widths — no lane padding of HBM streams).
    w1 = jnp.stack([lp["w1"] for lp in params["layers"]])                      # (L, D, 2D)
    b1 = jnp.stack([lp["b1"] for lp in params["layers"]])                      # (L, 1, 2D)
    w2 = jnp.stack([lp["w2"] for lp in params["layers"]])                      # (L, 2D, D)
    b2 = jnp.stack([lp["b2"] for lp in params["layers"]])                      # (L, 1, D)
    gamma = jnp.stack([lp["gamma"] for lp in params["layers"]])                # (L, 1, D)
    beta = jnp.stack([lp["beta"] for lp in params["layers"]])                  # (L, 1, D)

    return fused_gnn_forward(adj, h0, eagg, w1, b1, w2, b2, gamma, beta)       # JK='last'


# ---------------------------------------------------------------------------
# Pure-JAX reference (direct scatter formulation) for verification
# ---------------------------------------------------------------------------
def reference_forward(params, x, edge_index, edge_attr):
    h = sum(params["atom_emb"][i][x[:, i]] for i in range(len(params["atom_emb"])))
    src, dst = edge_index[0], edge_index[1]
    num_layer = len(params["layers"])
    for l, lp in enumerate(params["layers"]):
        eemb = sum(lp["bond_emb"][i][edge_attr[:, i]] for i in range(len(lp["bond_emb"])))
        msg = h[src] + eemb
        agg = jnp.zeros_like(h).at[dst].add(msg)
        h1 = jnp.maximum(agg @ lp["w1"] + lp["b1"], 0.0)
        h2 = h1 @ lp["w2"] + lp["b2"]
        mean = jnp.mean(h2, axis=0, keepdims=True)
        var = jnp.mean((h2 - mean) ** 2, axis=0, keepdims=True)
        h = lp["gamma"] * (h2 - mean) / jnp.sqrt(var + BN_EPS) + lp["beta"]
        if l != num_layer - 1:
            h = jnp.maximum(h, 0.0)
    return h


# ---------------------------------------------------------------------------
if __name__ == "__main__":
    key = jax.random.PRNGKey(0)
    k_param, k_x, k_ea, k_src, k_dst = jax.random.split(key, 5)

    # Small shapes consistent with the module (num_layer must be >= 2).
    num_layer = 2
    emb_dim = 32
    N = 8           # nodes
    E = 16          # edges
    atom_vocab_sizes = (5, 3)   # synthetic AtomEncoder: 2 categorical node features
    bond_vocab_sizes = (4, 3)   # synthetic BondEncoder: 2 categorical edge features
    # TODO(synk): OGB AtomEncoder/BondEncoder use 9/3 feature columns with fixed vocab lists;
    # here we use small synthetic vocabularies with identical sum-of-embeddings semantics.

    params = init_params(k_param, num_layer, emb_dim, atom_vocab_sizes, bond_vocab_sizes)

    # Deterministic example graph batch.
    x = jnp.stack(
        [jax.random.randint(k_x, (N,), 0, atom_vocab_sizes[0]),
         jax.random.randint(jax.random.fold_in(k_x, 1), (N,), 0, atom_vocab_sizes[1])],
        axis=1).astype(jnp.int32)                               # (N, 2)
    edge_attr = jnp.stack(
        [jax.random.randint(k_ea, (E,), 0, bond_vocab_sizes[0]),
         jax.random.randint(jax.random.fold_in(k_ea, 1), (E,), 0, bond_vocab_sizes[1])],
        axis=1).astype(jnp.int32)                               # (E, 2)
    edge_index = jnp.stack(
        [jax.random.randint(k_src, (E,), 0, N),
         jax.random.randint(k_dst, (E,), 0, N)],
        axis=0).astype(jnp.int32)                               # (2, E)

    out = gnn_forward(params, x, edge_index, edge_attr)
    out = jax.block_until_ready(out)

    ref = reference_forward(params, x, edge_index, edge_attr)
    assert out.shape == (N, emb_dim)
    assert jnp.allclose(out, ref, atol=1e-3, rtol=1e-3), (out, ref)

    print("KERNEL_OK")
</pallas_src>

<mosaic_0001>
module attributes {stable_mosaic.version = 11 : i64} {
  func.func private @main(%arg0: i32) attributes {dimension_semantics = [#tpu.dimension_semantics<core_parallel>], iteration_bounds = array<i64: 2>, tpu.core_type = #tpu.core_type<sc_scalar_subcore>, window_params = []} {
    return
  }
}

module attributes {stable_mosaic.version = 11 : i64} {
  func.func private @main(%arg0: i32) attributes {dimension_semantics = [#tpu.dimension_semantics<core_parallel>], iteration_bounds = array<i64: 2>, tpu.core_type = #tpu.core_type<sc_scalar_subcore>, window_params = []} {
    return
  }
}

module attributes {stable_mosaic.version = 11 : i64} {
  func.func @kernel(%arg0: i32, %arg1: memref<8x8xf32, #tpu.memory_space<any>>, %arg2: memref<8x32xf32, #tpu.memory_space<vmem>>, %arg3: memref<1x8x32xf32, #tpu.memory_space<vmem>>, %arg4: memref<1x32x64xf32, #tpu.memory_space<vmem>>, %arg5: memref<1x1x64xf32, #tpu.memory_space<vmem>>, %arg6: memref<1x64x32xf32, #tpu.memory_space<vmem>>, %arg7: memref<1x1x32xf32, #tpu.memory_space<vmem>>, %arg8: memref<1x1x32xf32, #tpu.memory_space<vmem>>, %arg9: memref<1x1x32xf32, #tpu.memory_space<vmem>>, %arg10: memref<8x32xf32, #tpu.memory_space<vmem>>, %arg11: memref<8x8xf32, #tpu.memory_space<vmem>>, %arg12: memref<!tpu.dma_semaphore, #tpu.memory_space<semaphore_mem>>) attributes {dimension_semantics = [#tpu.dimension_semantics<arbitrary>], iteration_bounds = array<i64: 2>, scalar_prefetch = 0 : i64, scratch_operands = 2 : i64, tpu.core_type = #tpu.core_type<tc>, window_params = [{}, {pipeline_mode = #tpu.pipeline_mode<synchronous>, transform_indices = @transform_1, window_bounds = array<i64: 8, 32>}, {transform_indices = @transform_2, window_bounds = array<i64: 1, 8, 32>}, {transform_indices = @transform_3, window_bounds = array<i64: 1, 32, 64>}, {transform_indices = @transform_4, window_bounds = array<i64: 1, 1, 64>}, {transform_indices = @transform_5, window_bounds = array<i64: 1, 64, 32>}, {transform_indices = @transform_6, window_bounds = array<i64: 1, 1, 32>}, {transform_indices = @transform_7, window_bounds = array<i64: 1, 1, 32>}, {transform_indices = @transform_8, window_bounds = array<i64: 1, 1, 32>}, {pipeline_mode = #tpu.pipeline_mode<synchronous>, transform_indices = @transform_9, window_bounds = array<i64: 8, 32>}]} {
    %c1_i32 = arith.constant 1 : i32
    %0 = arith.cmpi eq, %arg0, %c1_i32 : i32
    %c0_i32 = arith.constant 0 : i32
    %1 = arith.cmpi eq, %arg0, %c0_i32 : i32
    %2 = arith.extui %1 : i1 to i32
    %c0_i32_0 = arith.constant 0 : i32
    %3 = arith.cmpi ne, %2, %c0_i32_0 : i32
    scf.if %3 {
      tpu.enqueue_dma source(%arg1 : memref<8x8xf32, #tpu.memory_space<any>>) target(%arg11 : memref<8x8xf32, #tpu.memory_space<vmem>>) target_semaphore(%arg12 : memref<!tpu.dma_semaphore, #tpu.memory_space<semaphore_mem>>)
      %c0_35 = arith.constant 0 : index
      %c0_36 = arith.constant 0 : index
      %54 = vector.load %arg2[%c0_35, %c0_36] : memref<8x32xf32, #tpu.memory_space<vmem>>, vector<8x32xf32>
      %c0_37 = arith.constant 0 : index
      %c0_38 = arith.constant 0 : index
      %55 = vector.load %arg10[%c0_37, %c0_38] : memref<8x32xf32, #tpu.memory_space<vmem>>, vector<8x32xf32>
      tpu.vector_store %arg10[%c0_37, %c0_38], %54 {strides = array<i32>} : memref<8x32xf32, #tpu.memory_space<vmem>>, vector<8x32xf32>,
      tpu.wait_dma2 semaphore(%arg12 : memref<!tpu.dma_semaphore, #tpu.memory_space<semaphore_mem>>) src(%arg1 : memref<8x8xf32, #tpu.memory_space<any>>) dst(%arg11 : memref<8x8xf32, #tpu.memory_space<vmem>>)
    } else {
    }
    %c0 = arith.constant 0 : index
    %c0_1 = arith.constant 0 : index
    %4 = vector.load %arg10[%c0, %c0_1] : memref<8x32xf32, #tpu.memory_space<vmem>>, vector<8x32xf32>
    %c0_2 = arith.constant 0 : index
    %c0_3 = arith.constant 0 : index
    %5 = vector.load %arg11[%c0_2, %c0_3] : memref<8x8xf32, #tpu.memory_space<vmem>>, vector<8x8xf32>
    %cst = arith.constant dense<0.000000e+00> : vector<8x32xf32>
    %6 = tpu.matmul %5, %4, %cst {dimension_numbers = #tpu.dot_dimension_numbers<[1], [0], [0], [1], [0, 0, 1, 1], [], []>} : vector<8x8xf32>, vector<8x32xf32>, vector<8x32xf32> -> vector<8x32xf32>
    %c0_4 = arith.constant 0 : index
    %c0_5 = arith.constant 0 : index
    %c0_6 = arith.constant 0 : index
    %7 = vector.load %arg3[%c0_4, %c0_5, %c0_6] : memref<1x8x32xf32, #tpu.memory_space<vmem>>, vector<1x8x32xf32>
    %8 = vector.shape_cast %7 : vector<1x8x32xf32> to vector<8x32xf32>
    %9 = arith.addf %6, %8 : vector<8x32xf32>
    %c0_7 = arith.constant 0 : index
    %c0_8 = arith.constant 0 : index
    %c0_9 = arith.constant 0 : index
    %10 = vector.load %arg4[%c0_7, %c0_8, %c0_9] : memref<1x32x64xf32, #tpu.memory_space<vmem>>, vector<1x32x64xf32>
    %11 = vector.shape_cast %10 : vector<1x32x64xf32> to vector<32x64xf32>
    %cst_10 = arith.constant dense<0.000000e+00> : vector<8x64xf32>
    %12 = tpu.matmul %9, %11, %cst_10 {dimension_numbers = #tpu.dot_dimension_numbers<[1], [0], [0], [1], [0, 0, 1, 1], [], []>} : vector<8x32xf32>, vector<32x64xf32>, vector<8x64xf32> -> vector<8x64xf32>
    %c0_11 = arith.constant 0 : index
    %c0_12 = arith.constant 0 : index
    %c0_13 = arith.constant 0 : index
    %13 = vector.load %arg5[%c0_11, %c0_12, %c0_13] : memref<1x1x64xf32, #tpu.memory_space<vmem>>, vector<1x1x64xf32>
    %14 = vector.shape_cast %13 : vector<1x1x64xf32> to vector<1x64xf32>
    %15 = vector.broadcast %14 : vector<1x64xf32> to vector<8x64xf32>
    %16 = arith.addf %12, %15 : vector<8x64xf32>
    %cst_14 = arith.constant 0.000000e+00 : f32
    %17 = vector.broadcast %cst_14 : f32 to vector<8x64xf32>
    %18 = arith.maximumf %16, %17 : vector<8x64xf32>
    %c0_15 = arith.constant 0 : index
    %c0_16 = arith.constant 0 : index
    %c0_17 = arith.constant 0 : index
    %19 = vector.load %arg6[%c0_15, %c0_16, %c0_17] : memref<1x64x32xf32, #tpu.memory_space<vmem>>, vector<1x64x32xf32>
    %20 = vector.shape_cast %19 : vector<1x64x32xf32> to vector<64x32xf32>
    %cst_18 = arith.constant dense<0.000000e+00> : vector<8x32xf32>
    %21 = tpu.matmul %18, %20, %cst_18 {dimension_numbers = #tpu.dot_dimension_numbers<[1], [0], [0], [1], [0, 0, 1, 1], [], []>} : vector<8x64xf32>, vector<64x32xf32>, vector<8x32xf32> -> vector<8x32xf32>
    %c0_19 = arith.constant 0 : index
    %c0_20 = arith.constant 0 : index
    %c0_21 = arith.constant 0 : index
    %22 = vector.load %arg7[%c0_19, %c0_20, %c0_21] : memref<1x1x32xf32, #tpu.memory_space<vmem>>, vector<1x1x32xf32>
    %23 = vector.shape_cast %22 : vector<1x1x32xf32> to vector<1x32xf32>
    %24 = vector.broadcast %23 : vector<1x32xf32> to vector<8x32xf32>
    %25 = arith.addf %21, %24 : vector<8x32xf32>
    %cst_22 = arith.constant dense<0.000000e+00> : vector<32xf32>
    %26 = vector.multi_reduction <add>, %25, %cst_22 [0] : vector<8x32xf32> to vector<32xf32>
    %27 = vector.shape_cast %26 : vector<32xf32> to vector<1x32xf32>
    %cst_23 = arith.constant 1.250000e-01 : f32
    %28 = vector.broadcast %cst_23 : f32 to vector<1x32xf32>
    %29 = arith.mulf %27, %28 : vector<1x32xf32>
    %30 = vector.broadcast %29 : vector<1x32xf32> to vector<8x32xf32>
    %31 = arith.subf %25, %30 : vector<8x32xf32>
    %32 = arith.mulf %31, %31 : vector<8x32xf32>
    %cst_24 = arith.constant dense<0.000000e+00> : vector<32xf32>
    %33 = vector.multi_reduction <add>, %32, %cst_24 [0] : vector<8x32xf32> to vector<32xf32>
    %34 = vector.shape_cast %33 : vector<32xf32> to vector<1x32xf32>
    %cst_25 = arith.constant 1.250000e-01 : f32
    %35 = vector.broadcast %cst_25 : f32 to vector<1x32xf32>
    %36 = arith.mulf %34, %35 : vector<1x32xf32>
    %c0_26 = arith.constant 0 : index
    %c0_27 = arith.constant 0 : index
    %c0_28 = arith.constant 0 : index
    %37 = vector.load %arg8[%c0_26, %c0_27, %c0_28] : memref<1x1x32xf32, #tpu.memory_space<vmem>>, vector<1x1x32xf32>
    %38 = vector.shape_cast %37 : vector<1x1x32xf32> to vector<1x32xf32>
    %cst_29 = arith.constant 9.99999974E-6 : f32
    %39 = vector.broadcast %cst_29 : f32 to vector<1x32xf32>
    %40 = arith.addf %36, %39 : vector<1x32xf32>
    %41 = math.rsqrt %40 : vector<1x32xf32>
    %42 = arith.mulf %38, %41 : vector<1x32xf32>
    %43 = vector.broadcast %42 : vector<1x32xf32> to vector<8x32xf32>
    %44 = arith.mulf %31, %43 : vector<8x32xf32>
    %c0_30 = arith.constant 0 : index
    %c0_31 = arith.constant 0 : index
    %c0_32 = arith.constant 0 : index
    %45 = vector.load %arg9[%c0_30, %c0_31, %c0_32] : memref<1x1x32xf32, #tpu.memory_space<vmem>>, vector<1x1x32xf32>
    %46 = vector.shape_cast %45 : vector<1x1x32xf32> to vector<1x32xf32>
    %47 = vector.broadcast %46 : vector<1x32xf32> to vector<8x32xf32>
    %48 = arith.addf %44, %47 : vector<8x32xf32>
    %49 = arith.extui %0 : i1 to i32
    %c0_i32_33 = arith.constant 0 : i32
    %50 = arith.cmpi ne, %49, %c0_i32_33 : i32
    scf.if %50 {
      %c0_35 = arith.constant 0 : index
      %c0_36 = arith.constant 0 : index
      %54 = vector.load %arg10[%c0_35, %c0_36] : memref<8x32xf32, #tpu.memory_space<vmem>>, vector<8x32xf32>
      tpu.vector_store %arg10[%c0_35, %c0_36], %48 {strides = array<i32>} : memref<8x32xf32, #tpu.memory_space<vmem>>, vector<8x32xf32>,
    } else {
    }
    %true = arith.constant true
    %51 = arith.xori %0, %true : i1
    %52 = arith.extui %51 : i1 to i32
    %c0_i32_34 = arith.constant 0 : i32
    %53 = arith.cmpi ne, %52, %c0_i32_34 : i32
    scf.if %53 {
      %cst_35 = arith.constant 0.000000e+00 : f32
      %54 = vector.broadcast %cst_35 : f32 to vector<8x32xf32>
      %55 = arith.maximumf %48, %54 : vector<8x32xf32>
      %c0_36 = arith.constant 0 : index
      %c0_37 = arith.constant 0 : index
      %56 = vector.load %arg10[%c0_36, %c0_37] : memref<8x32xf32, #tpu.memory_space<vmem>>, vector<8x32xf32>
      tpu.vector_store %arg10[%c0_36, %c0_37], %55 {strides = array<i32>} : memref<8x32xf32, #tpu.memory_space<vmem>>, vector<8x32xf32>,
    } else {
    }
    return
  }
  func.func @transform_1(%arg0: i32) -> (i32, i32) {
    %c0_i32 = arith.constant 0 : i32
    %c0_i32_0 = arith.constant 0 : i32
    %c0_i32_1 = arith.constant 0 : i32
    return %c0_i32, %c0_i32_0 : i32, i32
  }
  func.func @transform_2(%arg0: i32) -> (i32, i32, i32) {
    %c0_i32 = arith.constant 0 : i32
    %c0_i32_0 = arith.constant 0 : i32
    %c0_i32_1 = arith.constant 0 : i32
    return %arg0, %c0_i32, %c0_i32_0 : i32, i32, i32
  }
  func.func @transform_3(%arg0: i32) -> (i32, i32, i32) {
    %c0_i32 = arith.constant 0 : i32
    %c0_i32_0 = arith.constant 0 : i32
    %c0_i32_1 = arith.constant 0 : i32
    return %arg0, %c0_i32, %c0_i32_0 : i32, i32, i32
  }
  func.func @transform_4(%arg0: i32) -> (i32, i32, i32) {
    %c0_i32 = arith.constant 0 : i32
    %c0_i32_0 = arith.constant 0 : i32
    %c0_i32_1 = arith.constant 0 : i32
    return %arg0, %c0_i32, %c0_i32_0 : i32, i32, i32
  }
  func.func @transform_5(%arg0: i32) -> (i32, i32, i32) {
    %c0_i32 = arith.constant 0 : i32
    %c0_i32_0 = arith.constant 0 : i32
    %c0_i32_1 = arith.constant 0 : i32
    return %arg0, %c0_i32, %c0_i32_0 : i32, i32, i32
  }
  func.func @transform_6(%arg0: i32) -> (i32, i32, i32) {
    %c0_i32 = arith.constant 0 : i32
    %c0_i32_0 = arith.constant 0 : i32
    %c0_i32_1 = arith.constant 0 : i32
    return %arg0, %c0_i32, %c0_i32_0 : i32, i32, i32
  }
  func.func @transform_7(%arg0: i32) -> (i32, i32, i32) {
    %c0_i32 = arith.constant 0 : i32
    %c0_i32_0 = arith.constant 0 : i32
    %c0_i32_1 = arith.constant 0 : i32
    return %arg0, %c0_i32, %c0_i32_0 : i32, i32, i32
  }
  func.func @transform_8(%arg0: i32) -> (i32, i32, i32) {
    %c0_i32 = arith.constant 0 : i32
    %c0_i32_0 = arith.constant 0 : i32
    %c0_i32_1 = arith.constant 0 : i32
    return %arg0, %c0_i32, %c0_i32_0 : i32, i32, i32
  }
  func.func @transform_9(%arg0: i32) -> (i32, i32) {
    %c0_i32 = arith.constant 0 : i32
    %c0_i32_0 = arith.constant 0 : i32
    %c0_i32_1 = arith.constant 0 : i32
    return %c0_i32, %c0_i32_0 : i32, i32
  }
}

</mosaic_0001>

<bundles_post_ra>
// kernel: gnn_forward.1
= control target key start
LH: loop header
LB: loop body
LE: loop exit
PB: predicated region body
PF: predicated region fallthrough
CT: control target
= control target key end

     0   :  { %14 = vsyncpa [#allocation5], 0  ;;  %s1051_s30 = smov 0   ;;  %s1182_s0 = inlined_call_operand.hbm [shape: f32[8,8], index: 0, kind: input, shape index: {}]   ;;  %s1183_s1 = inlined_call_operand.vmem [shape: f32[8,32], index: 1, kind: input, shape index: {}]   ;;  %s1184_s2 = inlined_call_operand.vmem [shape: f32[2,8,32], index: 2, kind: input, shape index: {}]   ;;  %s1185_s3 = inlined_call_operand.vmem [shape: f32[2,32,64], index: 3, kind: input, shape index: {}]   ;;  %s1186_s4 = inlined_call_operand.vmem [shape: f32[2,1,64], index: 4, kind: input, shape index: {}]   ;;  %s1187_s5 = inlined_call_operand.vmem [shape: f32[2,64,32], index: 5, kind: input, shape index: {}]   ;;  %s1188_s6 = inlined_call_operand.vmem [shape: f32[2,1,32], index: 6, kind: input, shape index: {}]   ;;  %s1189_s7 = inlined_call_operand.vmem [shape: f32[2,1,32], index: 7, kind: input, shape index: {}]   ;;  %s1190_s8 = inlined_call_operand.vmem [shape: f32[2,1,32], index: 8, kind: input, shape index: {}]   ;;  %s1191_s9 = inlined_call_operand.hbm [shape: f32[8,32], index: 9, kind: output, shape index: {}]  }
   0x1 LB: > { %s1057_s10 = sadd.s32 4294967295, %s994_s30   ;;  %p822_p0 = scmp.ge.s32.totalorder %s994_s30, 1  ;;  %s994_s30 = sphi %s1051_s30, %s20_s30  }
   0x2   : > { %p310_p1 = scmp.lt.s32.totalorder %s994_s30, 3 }
   0x4   : > { %p311_p2 = pnand %p822_p0, %p310_p1 }
   0x5   : > { %p360_p3 = scmp.lt.s32.totalorder (!%p311_p2), %s1057_s10, 1  ;;  %p828_p4 = scmp.ne.s32.totalorder (!%p311_p2), %s1057_s10, 0 }
   0x6   : > { %314 = sbr.rel (%p311_p2) target bundleno = 774 (0x306), region = 52 }
   0xd   : > { %s1063_s11 = scalar_select %p360_p3, %s1057_s10, 1 }
   0xe   : > { %390 = sbr.rel (%p828_p4) target bundleno = 37 (0x25), region = 56  ;;  %v402_v0 = vld [vmem:[%s1183_s1] sm:$0xff] (!%p828_p4)  ;;  %vm403_vm0 = vcmask (!%p828_p4), 261120   ;;  %s934_s28 = scalar_lea.hbm (!%p828_p4), %s1182_s0, 128 }
   0xf   : > { %s823_s12 = sshll.u32 %s1063_s11, 3  ;;  %s842_s13 = sshll.u32 %s1063_s11, 5  ;;  %404 = vst.msk [vmem:[#allocation4] sm:$0xff] (!%p828_p4), %vm403_vm0, %v402_v0 }
  0x10   : > { %s1070_s16 = scalar_lea.vmem %s1184_s2, %s823_s12  ;;  %s1075_s19 = scalar_lea.vmem %s1185_s3, %s842_s13 }
  0x11   : > { %s371_s22 = scalar_lea.vmem %s1186_s4, %s1063_s11  ;;  %s843_s23 = sshll.u32 %s1063_s11, 6 }
  0x12   : > { %s1085_s26 = scalar_lea.vmem %s1187_s5, %s843_s23  ;;  %s379_s29 = scalar_lea.vmem %s1188_s6, %s1063_s11 }
  0x13   : > { %s382_s15 = scalar_lea.vmem %s1189_s7, %s1063_s11  ;;  %s385_s18 = scalar_lea.vmem %s1190_s8, %s1063_s11 }
  0x14   : > { %s996_s23 = smov (!%p828_p4), [#allocation2]   ;;  %p935_p5 = scmp.ne.s32.totalorder (!%p828_p4), %s1182_s0, %s934_s28 }
  0x15   : > { %s398_s24 = sshll.u32 %s996_s23, 4  ;;  %p938_p6 = scmp.lt.u32.totalorder %s934_s28, %s1182_s0  ;;  %s399_s24 = int_to_ptr.vmem [resolvable:$true] %s398_s24 }
  0x17   : > { %p940_p7 = pnand %p938_p6, %p935_p5 }
  0x19   : > { %943 = shalt.err (!%p940_p7)  }
  0x1a   : > { %s944_s20 = scalar_lea.vmem %s399_s24, 128  ;;  %p949_p9 = scmp.lt.s32.totalorder %s399_s24, %s399_s24 }
  0x1b   : > { %p945_p8 = scmp.ne.s32.totalorder %s399_s24, %s944_s20  ;;  %p950_p10 = scmp.lt.s32.totalorder %s944_s20, %s944_s20 }
  0x1d   : > { %p951_p11 = por %p950_p10, %p949_p9 }
  0x1f   : > { %p952_p12 = pnand %p951_p11, %p945_p8 }
  0x21   : > { %955 = shalt.err (!%p952_p12)  }
  0x22   : > { %401 = dma.hbm_to_vmem [thread:$0]  %s1182_s0, 128, %s399_s24, [#allocation3] }
  0x23   : > { %986 = dma.done.wait [#allocation3], 128 }
  0x24   : > { %987 = vsyncadd [#allocation3], 4294967168 }
  0x25 PF: > { %v409_v2 = vld [vmem:[#allocation2] sm:$0xff]  ;;  %vm411_vm1 = vcmask 64512   ;;  %v997_v3 = vmov 0.0   ;;  %vm998_vm2 = vmmov 0   ;;  %v486_v5 = vld [vmem:[%s1075_s19 + $0x8] sm:$0xff]  ;;  %v999_v7 = vmov 0.0|0.0  }
  0x26   : > { %v408_v1 = vld [vmem:[#allocation4] sm:$0xff]  ;;  %860 = vmatprep.subr.mxu1 %v997_v3  ;;  %862 = vmatprep.mubr.msk.f32.mxu1 %vm998_vm2, %v997_v3  ;;  %v485_v4 = vld [vmem:[%s1075_s19] sm:$0xff]  ;;  %v487_v8 = vld [vmem:[%s1075_s19 + $0x10] sm:$0xff]  ;;  %vm496_vm3 = vcmask 261120   ;;  %vm586_vm4 = vcmask 523264   ;;  %v683_v55 = vlaneseq  ;;  %p835_p13 = scmp.ne.s32.totalorder %s1057_s10, 1 }
  0x27   : > { %861 = vmatpush3.msra.mxu1 %v408_v1  ;;  %v896_v6 = vpack.c.bf16 %v486_v5, %v485_v4  ;;  %901 = vmatprep.subr.bf16.mxu0 %v999_v7  ;;  %v488_v9 = vld [vmem:[%s1075_s19 + $0x18] sm:$0xff]  ;;  %v571_v11 = vld [vmem:[%s1085_s26] sm:$0xff]  ;;  %v572_v12 = vld [vmem:[%s1085_s26 + $0x8] sm:$0xff] }
  0x28   : > { %863 = vmatmul.mubr.msk.f32.vlgmr.msra.gmra.mrb[0].mxu1 %vm411_vm1, %v409_v2  ;;  %895 = vmatprep.subr.bf16.mxu1 %v999_v7  ;;  %v899_v10 = vpack.c.bf16 %v488_v9, %v487_v8  ;;  %v573_v13 = vld [vmem:[%s1085_s26 + $0x10] sm:$0xff]  ;;  %v902_v14 = vpack.c.bf16 %v572_v12, %v571_v11  ;;  %v574_v15 = vld [vmem:[%s1085_s26 + $0x18] sm:$0xff]  ;;  %v575_v17 = vld [vmem:[%s1085_s26 + $0x20] sm:$0xff]  ;;  %v684_v56 = vshrl.u32 %v683_v55, 7 }
  0x29   : > { %897 = vmatpush3.bf16.msra.mxu1 %v896_v6  ;;  %873 = vmatprep.mubr.msk.f32.mxu1 %vm998_vm2, %v997_v3  ;;  %v905_v16 = vpack.c.bf16 %v574_v15, %v573_v13  ;;  %v576_v18 = vld [vmem:[%s1085_s26 + $0x28] sm:$0xff]  ;;  %v410_v20 = vld [vmem:[%s1070_s16] sm:$0xff]  ;;  %v577_v24 = vld [vmem:[%s1085_s26 + $0x30] sm:$0xff] }
  0x2a   : > { %898 = vmatprep.subr.bf16.mxu1 %v999_v7  ;;  %892 = vmatprep.mubr.msk.f32.mxu0 %vm998_vm2, %v997_v3  ;;  %v908_v19 = vpack.c.bf16 %v576_v18, %v575_v17  ;;  %v578_v25 = vld [vmem:[%s1085_s26 + $0x38] sm:$0xff]  ;;  %v830_v27 = vld [vmem:[%s371_s22] ss:$0 sm:$0xff]  ;;  %v685_v58 = vsub.s32 0, %v684_v56 }
  0x2b   : > { %903 = vmatpush3.bf16.msra.mxu0 %v902_v14  ;;  %v911_v26 = vpack.c.bf16 %v578_v25, %v577_v24  ;;  %v832_v32 = vld [vmem:[%s379_s29] ss:$0 sm:$0xff] }
  0x2c   : > { %904 = vmatprep.subr.bf16.mxu0 %v999_v7  ;;  %v678_v57 = vld [vmem:[%s382_s15] sm:$0x1] }
  0x2d   : > { %900 = vmatpush3.bf16.msra.mxu1 %v899_v10  ;;  %v834_v62 = vld [vmem:[%s385_s18] ss:$0 sm:$0xff] }
  0x2f   : > { %906 = vmatpush3.bf16.msra.mxu0 %v905_v16 }
  0x30   : > { %907 = vmatprep.subr.bf16.mxu0 %v999_v7 }
  0x33   : > { %909 = vmatpush3.bf16.msra.mxu0 %v908_v19 }
  0x34   : > { %910 = vmatprep.subr.bf16.mxu0 %v999_v7 }
  0x37   : > { %912 = vmatpush3.bf16.msra.mxu0 %v911_v26 }
  0xfb   : > { %v481_v21 = vpop.f32.mrb[0].mxu1 }
  0xfc   : > { %v482_v22 = vadd.f32 %v481_v21, %v410_v20  ;;  %v864_v23 = vpop.f32.mrb[1].mxu1 }
  0xfe   : > { %874 = vmatmul.mubr.msk.f32.vlgmr.msra.gmra.mrb[2].mxu1 %vm496_vm3, %v482_v22 }
 0x1d1   : > { %v566_v28 = vpop.f32.mrb[2].mxu1 }
 0x1d2   : > { %v567_v29 = vadd.f32 %v830_v27, %v566_v28  ;;  %v875_v30 = vpop.f32.mrb[3].mxu1 }
 0x1d4   : > { %v570_v31 = vmax.f32 %v567_v29, 0.0 }
 0x1d6   : > { %893 = vmatmul.mubr.msk.f32.vlgmr.msra.gmra.mrb[0].mxu0 %vm586_vm4, %v570_v31 }
 0x2a9   : > { %v656_v33 = vpop.f32.mrb[0].mxu0 }
 0x2aa   : > { %v657_v34 = vadd.f32 %v832_v32, %v656_v33  ;;  %v894_v35 = vpop.f32.mrb[1].mxu0 }
 0x2ac   : > { %v660_v36 = vsel %vm496_vm3, %v657_v34, 0.0 }
 0x2ad   : > { %v661_v37 = vrot.slane %v660_v36, 4 }
 0x2af   : > { %v662_v38 = vadd.f32 %v661_v37, %v660_v36 }
 0x2b1   : > { %v663_v39 = vrot.slane %v662_v38, 2 }
 0x2b3   : > { %v664_v40 = vadd.f32 %v663_v39, %v662_v38 }
 0x2b5   : > { %v665_v41 = vrot.slane %v664_v40, 1 }
 0x2b7   : > { %v666_v42 = vadd.f32 %v665_v41, %v664_v40 }
 0x2b9   : > { %v667_v43 = vmul.f32 0.125, %v666_v42 }
 0x2bb   : > { %v668_v44 = vsub.f32 %v657_v34, %v667_v43 }
 0x2bd   : > { %v669_v45 = vmul.f32 %v668_v44, %v668_v44 }
 0x2bf   : > { %v670_v46 = vsel %vm496_vm3, %v669_v45, 0.0 }
 0x2c0   : > { %v671_v47 = vrot.slane %v670_v46, 4 }
 0x2c2   : > { %v672_v48 = vadd.f32 %v671_v47, %v670_v46 }
 0x2c4   : > { %v673_v49 = vrot.slane %v672_v48, 2 }
 0x2c6   : > { %v674_v50 = vadd.f32 %v673_v49, %v672_v48 }
 0x2c8   : > { %v675_v51 = vrot.slane %v674_v50, 1 }
 0x2ca   : > { %v676_v52 = vadd.f32 %v675_v51, %v674_v50 }
 0x2cc   : > { %v677_v53 = vmul.f32 0.125, %v676_v52 }
 0x2ce   : > { %v679_v54 = vadd.f32 1e-05, %v677_v53 }
 0x2d0   : > { %932 = vrsqrt.f32 %v679_v54 }
 0x2da   : > { %v933_v59 = vpop.eup %932 }
 0x2db   : > { %v681_v60 = vmul.f32 %v933_v59, %v678_v57  ;;  %699 = sbr.rel (%p835_p13) target bundleno = 740 (0x2e4), region = 64 }
 0x2dd   : > { %v686_v61 = vrot.slane %v681_v60, %v685_v58 }
 0x2df   : > { %v688_v63 = vmul.f32 %v686_v61, %v668_v44 }
 0x2e1   : > { %v696_v0 = vadd.f32 %v834_v62, %v688_v63 }
 0x2e3   : > { %700 = vst.msk [vmem:[#allocation4] sm:$0xff] %vm496_vm3, %v696_v0 }
 0x2e4 PF: > { %p836_p0 = scmp.eq.s32.totalorder %s1057_s10, 1 }
 0x2e5   : > { %v705_v1 = vmax.f32 (!%p836_p0), %v696_v0, 0.0 }
 0x2e6   : > { %704 = sbr.rel (%p836_p0) target bundleno = 749 (0x2ed), region = 68 }
 0x2e7   : > { %706 = vst.msk [vmem:[#allocation4] sm:$0xff] (!%p836_p0), %vm496_vm3, %v705_v1 }
 0x2ed PF: > { %s1000_s15 = smov [#allocation4]  }
 0x2ee   : > { %s714_s11 = sshll.u32 %s1000_s15, 4  ;;  %s715_s11 = int_to_ptr.vmem [resolvable:$true] %s714_s11 }
 0x2ef   : > { %s956_s18 = scalar_lea.vmem %s715_s11, 128  ;;  %p963_p4 = scmp.lt.s32.totalorder %s715_s11, %s715_s11 }
 0x2f0   : > { %p957_p1 = scmp.ne.s32.totalorder %s715_s11, %s956_s18  ;;  %p964_p5 = scmp.lt.s32.totalorder %s956_s18, %s956_s18 }
 0x2f2   : > { %p958_p2 = pnand %p957_p1, %p836_p0  ;;  %p965_p6 = por %p964_p5, %p963_p4 }
 0x2f4   : > { %p959_p3 = pneg %p958_p2 }
 0x2f6   : > { %p966_p7 = pnand %p965_p6, %p959_p3 }
 0x2f8   : > { %969 = shalt.err (!%p966_p7)
}
 0x2f9   : > { %s970_s14 = scalar_lea.hbm %s1191_s9, 128 }
 0x2fa   : > { %p971_p8 = scmp.ne.s32.totalorder %s1191_s9, %s970_s14  ;;  %p976_p11 = scmp.lt.u32.totalorder %s970_s14, %s1191_s9 }
 0x2fc   : > { %p972_p9 = pnand %p971_p8, %p836_p0 }
 0x2fe   : > { %p973_p10 = pneg %p972_p9 }
 0x300   : > { %p978_p12 = pnand %p976_p11, %p973_p10 }
 0x302   : > { %981 = shalt.err (!%p978_p12)
}
 0x303   : > { %914 = dma.vmem_to_hbm [thread:$0]  (%p836_p0), %s715_s11, 128, %s1191_s9, [#allocation5]  }
 0x304   : > { %989 = dma.done.wait (%p836_p0), [#allocation5], 128  }
 0x305   : > { %991 = vsyncadd (%p836_p0), [#allocation5], 4294967168 }
 0x306 PF: > { %s20_s30 = sadd.s32 1, %s994_s30  }
 0x307   : > { %p17_p13 = scmp.ge.s32.totalorder %s20_s30, 4  }
 0x309   :  { %19 = sbr.rel (!%p17_p13) target bundleno = 1 (0x1), region = 113 }
 0x310   :  { %727 = vsyncpa [#allocation5], 1 }
 0x311   :  { %729 = vsyncpa [#allocation5 + $0x1], 1 }
 0x312   :  { %730 = vsyncmov [#allocation3] }
 0x315   :  { %s731_s24 = vpop.sfrf %730 }
 0x316   :  { %p841_p1 = scmp.ne.s32.totalorder %s731_s24, 0 }
 0x318   :  { %735 = shalt.err (%p841_p1)  }

</bundles_post_ra>
